<compile_context>
chip_gen: v7x
topology: tpu7x:2x2x1
jax: 0.10.0
libtpu: 0.0.40
codegen_flags: <defaults>
</compile_context>

<pallas_src>
import functools

import jax
import jax.numpy as jnp
from jax.experimental import pallas as pl
from jax.experimental.pallas import tpu as pltpu


def _round_up(x, m):
    return ((x + m - 1) // m) * m


def _node_update_kernel(h_ref, self_h_ref, tmp_ref, norm_ref,
                        w1_ref, w2_ref, b_ref, o_ref):
    # Upcast bf16 activations to f32 right after load (v5e VPU has no bf16;
    # on v6e/v7x the cast is cheap and keeps a single code path / exact f32 math).
    h = h_ref[...].astype(jnp.float32)
    self_h = self_h_ref[...].astype(jnp.float32)
    tmp = tmp_ref[...].astype(jnp.float32)

    # message transform: (h - self_h_tmp) * norm   (norm is [TILE_N, 1], broadcasts)
    h_m = (h - tmp) * norm_ref[...]

    # concat([self_h, h_m], 1) @ W.T == self_h @ W1 + h_m @ W2  (MXU, f32 accumulate)
    acc = jnp.dot(self_h, w1_ref[...], preferred_element_type=jnp.float32)
    acc = acc + jnp.dot(h_m, w2_ref[...], preferred_element_type=jnp.float32)
    acc = acc + b_ref[...]                       # bias [1, out_dim], broadcasts
    o_ref[...] = jnp.maximum(acc, 0.0).astype(o_ref.dtype)


def prepare_params(weight, bias, feat_dim):
    """One-time parameter preprocessing (hoisted out of the forward path).

    weight : [out_dim, in_dim] float32 (PyTorch nn.Linear layout), in_dim = 2*feat_dim
    bias   : [out_dim] float32
    returns: (w1 [F, out_dim], w2 [F, out_dim], b2d [1, out_dim])
    """
    out_dim, in_dim = weight.shape
    assert in_dim == 2 * feat_dim, "Linear in_dim must equal 2 * feature dim"
    w_t = jnp.transpose(weight).astype(jnp.float32)      # [in_dim, out_dim]
    w1 = w_t[:feat_dim, :]                               # applies to self_h
    w2 = w_t[feat_dim:, :]                               # applies to transformed message
    b2d = bias.astype(jnp.float32).reshape(1, out_dim)
    return w1, w2, b2d


@functools.partial(jax.jit, static_argnames=("tile_n",))
def node_update(h, self_h, self_h_tmp, norm, w1, w2, b2d, *, tile_n=4096):
    """
    h, self_h, self_h_tmp : [N, F] bfloat16 (or float32) activations
    norm                  : [N, 1] float32 (block.dstdata['subg_norm'] / 'norm')
    w1, w2                : [F, out_dim] float32 (from prepare_params)
    b2d                   : [1, out_dim] float32
    returns               : [N, out_dim] float32
    """
    n, f = h.shape
    out_dim = w1.shape[1]

    # Row-tile size: multiple of 8, no larger than needed for this N.
    tile_n = max(8, min(_round_up(tile_n, 8), _round_up(n, 8)))
    grid = (pl.cdiv(n, tile_n),)   # no wrapper-side padding; last block is masked

    row_spec = pl.BlockSpec((tile_n, f), lambda i: (i, 0))
    norm_spec = pl.BlockSpec((tile_n, 1), lambda i: (i, 0))
    w_spec = pl.BlockSpec((f, out_dim), lambda i: (0, 0))       # VMEM-resident
    b_spec = pl.BlockSpec((1, out_dim), lambda i: (0, 0))       # VMEM-resident
    out_spec = pl.BlockSpec((tile_n, out_dim), lambda i: (i, 0))  # unpadded, full last dim

    return pl.pallas_call(
        _node_update_kernel,
        out_shape=jax.ShapeDtypeStruct((n, out_dim), jnp.float32),
        grid=grid,
        in_specs=[row_spec, row_spec, row_spec, norm_spec, w_spec, w_spec, b_spec],
        out_specs=out_spec,
        compiler_params=pltpu.CompilerParams(
            dimension_semantics=("parallel",),   # shard node tiles across TCs (v7x)
        ),
    )(h, self_h, self_h_tmp, norm, w1, w2, b2d)


def node_update_ref(h, self_h, self_h_tmp, norm, weight, bias):
    """Pure-JAX reference mirroring the PyTorch forward (test=False path)."""
    hm = (h - self_h_tmp) * norm
    z = jnp.concatenate([self_h, hm], axis=1)
    return jax.nn.relu(z @ weight.T + bias)


if __name__ == "__main__":
    key = jax.random.PRNGKey(0)
    k_h, k_sh, k_tmp, k_norm, k_w, k_b = jax.random.split(key, 6)

    N, F = 256, 32            # nodes x feature dim (small test shapes)
    in_dim, out_dim = 2 * F, 32

    h32 = jax.random.normal(k_h, (N, F), dtype=jnp.float32)
    self_h32 = jax.random.normal(k_sh, (N, F), dtype=jnp.float32)
    tmp32 = jax.random.normal(k_tmp, (N, F), dtype=jnp.float32)
    # subg_norm is a per-node positive scalar (degree normalization)
    subg_norm = jax.random.uniform(k_norm, (N, 1), dtype=jnp.float32,
                                   minval=0.1, maxval=1.0)

    # deterministic nn.Linear-style init: U(-1/sqrt(in_dim), 1/sqrt(in_dim))
    bound = 1.0 / (in_dim ** 0.5)
    weight = jax.random.uniform(k_w, (out_dim, in_dim), dtype=jnp.float32,
                                minval=-bound, maxval=bound)
    bias = jax.random.uniform(k_b, (out_dim,), dtype=jnp.float32,
                              minval=-bound, maxval=bound)

    # Activations live in HBM as bf16 (halves HBM read traffic; math stays f32).
    h = h32.astype(jnp.bfloat16)
    self_h = self_h32.astype(jnp.bfloat16)
    self_h_tmp = tmp32.astype(jnp.bfloat16)

    # One-time parameter prep (transpose / split) — hoisted out of the forward.
    w1, w2, b2d = prepare_params(weight, bias, F)

    # Small tile_n here so the test exercises >1 grid step.
    out = node_update(h, self_h, self_h_tmp, subg_norm, w1, w2, b2d, tile_n=128)
    out = jax.block_until_ready(out)
    assert out.shape == (N, out_dim), out.shape

    # Reference with the same bf16 input rounding (in-kernel math is f32).
    ref = node_update_ref(h.astype(jnp.float32), self_h.astype(jnp.float32),
                          self_h_tmp.astype(jnp.float32), subg_norm, weight, bias)
    assert jnp.allclose(out, ref, atol=1e-5, rtol=1e-5), "mismatch vs bf16-input reference"

    # Loose sanity check against the original full-f32 semantics.
    ref32 = node_update_ref(h32, self_h32, tmp32, subg_norm, weight, bias)
    assert jnp.allclose(out, ref32, atol=5e-2, rtol=5e-2), "mismatch vs f32 reference"

    # Tail case: N not a multiple of tile_n (last partial block write is masked).
    Nt = 200
    out_t = node_update(h[:Nt], self_h[:Nt], self_h_tmp[:Nt], subg_norm[:Nt],
                        w1, w2, b2d, tile_n=128)
    out_t = jax.block_until_ready(out_t)
    assert out_t.shape == (Nt, out_dim), out_t.shape
    assert jnp.allclose(out_t, ref[:Nt], atol=1e-5, rtol=1e-5), "tail mismatch"

    print("KERNEL_OK")
</pallas_src>

<mosaic_0001>
module attributes {stable_mosaic.version = 11 : i64} {
  func.func @_node_update_kernel(%arg0: i32, %arg1: memref<128x32xbf16, #tpu.memory_space<vmem>>, %arg2: memref<128x32xbf16, #tpu.memory_space<vmem>>, %arg3: memref<128x32xbf16, #tpu.memory_space<vmem>>, %arg4: memref<128x1xf32, #tpu.memory_space<vmem>>, %arg5: memref<32x32xf32, #tpu.memory_space<vmem>>, %arg6: memref<32x32xf32, #tpu.memory_space<vmem>>, %arg7: memref<1x32xf32, #tpu.memory_space<vmem>>, %arg8: memref<128x32xf32, #tpu.memory_space<vmem>>) attributes {dimension_semantics = [#tpu.dimension_semantics<parallel>], iteration_bounds = array<i64: 2>, scalar_prefetch = 0 : i64, scratch_operands = 0 : i64, tpu.core_type = #tpu.core_type<tc>, window_params = [{transform_indices = @transform_0, window_bounds = array<i64: 128, 32>}, {transform_indices = @transform_1, window_bounds = array<i64: 128, 32>}, {transform_indices = @transform_2, window_bounds = array<i64: 128, 32>}, {transform_indices = @transform_3, window_bounds = array<i64: 128, 1>}, {pipeline_mode = #tpu.pipeline_mode<synchronous>, transform_indices = @transform_4, window_bounds = array<i64: 32, 32>}, {pipeline_mode = #tpu.pipeline_mode<synchronous>, transform_indices = @transform_5, window_bounds = array<i64: 32, 32>}, {pipeline_mode = #tpu.pipeline_mode<synchronous>, transform_indices = @transform_6, window_bounds = array<i64: 1, 32>}, {transform_indices = @transform_7, window_bounds = array<i64: 128, 32>}]} {
    %c0 = arith.constant 0 : index
    %c0_0 = arith.constant 0 : index
    %0 = vector.load %arg1[%c0, %c0_0] : memref<128x32xbf16, #tpu.memory_space<vmem>>, vector<128x32xbf16>
    %1 = arith.extf %0 : vector<128x32xbf16> to vector<128x32xf32>
    %c0_1 = arith.constant 0 : index
    %c0_2 = arith.constant 0 : index
    %2 = vector.load %arg2[%c0_1, %c0_2] : memref<128x32xbf16, #tpu.memory_space<vmem>>, vector<128x32xbf16>
    %3 = arith.extf %2 : vector<128x32xbf16> to vector<128x32xf32>
    %c0_3 = arith.constant 0 : index
    %c0_4 = arith.constant 0 : index
    %4 = vector.load %arg3[%c0_3, %c0_4] : memref<128x32xbf16, #tpu.memory_space<vmem>>, vector<128x32xbf16>
    %5 = arith.extf %4 : vector<128x32xbf16> to vector<128x32xf32>
    %6 = arith.subf %1, %5 : vector<128x32xf32>
    %c0_5 = arith.constant 0 : index
    %c0_6 = arith.constant 0 : index
    %7 = vector.load %arg4[%c0_5, %c0_6] : memref<128x1xf32, #tpu.memory_space<vmem>>, vector<128x1xf32>
    %8 = vector.broadcast %7 : vector<128x1xf32> to vector<128x32xf32>
    %9 = arith.mulf %6, %8 : vector<128x32xf32>
    %c0_7 = arith.constant 0 : index
    %c0_8 = arith.constant 0 : index
    %10 = vector.load %arg5[%c0_7, %c0_8] : memref<32x32xf32, #tpu.memory_space<vmem>>, vector<32x32xf32>
    %cst = arith.constant dense<0.000000e+00> : vector<128x32xf32>
    %11 = tpu.matmul %3, %10, %cst {dimension_numbers = #tpu.dot_dimension_numbers<[1], [0], [0], [1], [0, 0, 1, 1], [], []>} : vector<128x32xf32>, vector<32x32xf32>, vector<128x32xf32> -> vector<128x32xf32>
    %c0_9 = arith.constant 0 : index
    %c0_10 = arith.constant 0 : index
    %12 = vector.load %arg6[%c0_9, %c0_10] : memref<32x32xf32, #tpu.memory_space<vmem>>, vector<32x32xf32>
    %cst_11 = arith.constant dense<0.000000e+00> : vector<128x32xf32>
    %13 = tpu.matmul %9, %12, %cst_11 {dimension_numbers = #tpu.dot_dimension_numbers<[1], [0], [0], [1], [0, 0, 1, 1], [], []>} : vector<128x32xf32>, vector<32x32xf32>, vector<128x32xf32> -> vector<128x32xf32>
    %14 = arith.addf %11, %13 : vector<128x32xf32>
    %c0_12 = arith.constant 0 : index
    %c0_13 = arith.constant 0 : index
    %15 = vector.load %arg7[%c0_12, %c0_13] : memref<1x32xf32, #tpu.memory_space<vmem>>, vector<1x32xf32>
    %16 = vector.broadcast %15 : vector<1x32xf32> to vector<128x32xf32>
    %17 = arith.addf %14, %16 : vector<128x32xf32>
    %cst_14 = arith.constant 0.000000e+00 : f32
    %18 = vector.broadcast %cst_14 : f32 to vector<128x32xf32>
    %19 = arith.maximumf %17, %18 : vector<128x32xf32>
    %c0_15 = arith.constant 0 : index
    %c0_16 = arith.constant 0 : index
    %20 = vector.load %arg8[%c0_15, %c0_16] : memref<128x32xf32, #tpu.memory_space<vmem>>, vector<128x32xf32>
    tpu.vector_store %arg8[%c0_15, %c0_16], %19 {strides = array<i32>} : memref<128x32xf32, #tpu.memory_space<vmem>>, vector<128x32xf32>,
    return
  }
  func.func @transform_0(%arg0: i32) -> (i32, i32) {
    %c0_i32 = arith.constant 0 : i32
    %c0_i32_0 = arith.constant 0 : i32
    return %arg0, %c0_i32 : i32, i32
  }
  func.func @transform_1(%arg0: i32) -> (i32, i32) {
    %c0_i32 = arith.constant 0 : i32
    %c0_i32_0 = arith.constant 0 : i32
    return %arg0, %c0_i32 : i32, i32
  }
  func.func @transform_2(%arg0: i32) -> (i32, i32) {
    %c0_i32 = arith.constant 0 : i32
    %c0_i32_0 = arith.constant 0 : i32
    return %arg0, %c0_i32 : i32, i32
  }
  func.func @transform_3(%arg0: i32) -> (i32, i32) {
    %c0_i32 = arith.constant 0 : i32
    %c0_i32_0 = arith.constant 0 : i32
    return %arg0, %c0_i32 : i32, i32
  }
  func.func @transform_4(%arg0: i32) -> (i32, i32) {
    %c0_i32 = arith.constant 0 : i32
    %c0_i32_0 = arith.constant 0 : i32
    %c0_i32_1 = arith.constant 0 : i32
    return %c0_i32, %c0_i32_0 : i32, i32
  }
  func.func @transform_5(%arg0: i32) -> (i32, i32) {
    %c0_i32 = arith.constant 0 : i32
    %c0_i32_0 = arith.constant 0 : i32
    %c0_i32_1 = arith.constant 0 : i32
    return %c0_i32, %c0_i32_0 : i32, i32
  }
  func.func @transform_6(%arg0: i32) -> (i32, i32) {
    %c0_i32 = arith.constant 0 : i32
    %c0_i32_0 = arith.constant 0 : i32
    %c0_i32_1 = arith.constant 0 : i32
    return %c0_i32, %c0_i32_0 : i32, i32
  }
  func.func @transform_7(%arg0: i32) -> (i32, i32) {
    %c0_i32 = arith.constant 0 : i32
    %c0_i32_0 = arith.constant 0 : i32
    return %arg0, %c0_i32 : i32, i32
  }
}

</mosaic_0001>

<bundles_post_ra>
// kernel: node_update.1
= control target key start
LH: loop header
LB: loop body
LE: loop exit
PB: predicated region body
PF: predicated region fallthrough
CT: control target
= control target key end

     0   :  { %s1477_s24 = smov 0   ;;  %s1687_s0 = inlined_call_operand.vmem [shape: bf16[256,32], index: 0, kind: input, shape index: {}]   ;;  %s1688_s1 = inlined_call_operand.vmem [shape: bf16[256,32], index: 1, kind: input, shape index: {}]   ;;  %s1689_s2 = inlined_call_operand.vmem [shape: bf16[256,32], index: 2, kind: input, shape index: {}]   ;;  %s1690_s3 = inlined_call_operand.vmem [shape: f32[256,1], index: 3, kind: input, shape index: {}]   ;;  %s1691_s4 = inlined_call_operand.vmem [shape: f32[32,32], index: 4, kind: input, shape index: {}]   ;;  %s1692_s5 = inlined_call_operand.vmem [shape: f32[32,32], index: 5, kind: input, shape index: {}]   ;;  %s1693_s6 = inlined_call_operand.vmem [shape: f32[1,32], index: 6, kind: input, shape index: {}]   ;;  %s1694_s7 = inlined_call_operand.vmem [shape: f32[256,32], index: 7, kind: output, shape index: {}]  }
   0x1 LB: > { %s1114_s25 = sadd.s32 4294967295, %s1434_s24   ;;  %p1118_p0 = scmp.ge.s32.totalorder %s1434_s24, 1  ;;  %s1434_s24 = sphi %s1477_s24, %s17_s24  }
   0x2   : > { %p271_p1 = scmp.lt.s32.totalorder %s1434_s24, 3 }
   0x4   : > { %p272_p2 = pnand %p1118_p0, %p271_p1 }
   0x5   : > { %s1119_s26 = sshll.u32 (!%p272_p2), %s1114_s25, 4  ;;  %v572_v0 = vld [vmem:[%s1691_s4] sm:$0xff] (!%p272_p2)  ;;  %v573_v1 = vld [vmem:[%s1691_s4 + $0x8] sm:$0xff] (!%p272_p2)  ;;  %v1436_v3 = vmov (!%p272_p2), 0   ;;  %v574_v7 = vld [vmem:[%s1691_s4 + $0x10] sm:$0xff] (!%p272_p2)  ;;  %vm580_vm0 = vcmask (!%p272_p2), 261120  }
   0x6   : > { %275 = sbr.rel (%p272_p2) target bundleno = 399 (0x18f), region = 48  ;;  %v576_v2 = vld [vmem:[%s1692_s5] sm:$0xff] (!%p272_p2)  ;;  %1427 = vset.pattern.permute.xlu1 (!%p272_p2), %v1436_v3  ;;  %1426 = vset.pattern.permute.xlu0 (!%p272_p2), %v1436_v3  ;;  %p319_p3 = scmp.lt.s32.totalorder (!%p272_p2), %s1119_s26, 31  ;;  %v1393_v4 = vpack.c.bf16 (!%p272_p2), %v573_v1, %v572_v0  ;;  %v577_v5 = vld [vmem:[%s1692_s5 + $0x8] sm:$0xff] (!%p272_p2)  ;;  %v575_v8 = vld [vmem:[%s1691_s4 + $0x18] sm:$0xff] (!%p272_p2) }
   0x7   : > { %v1385_v6 = vpack.c.bf16 (!%p272_p2), %v577_v5, %v576_v2  ;;  %v1397_v11 = vpack.c.bf16 (!%p272_p2), %v575_v8, %v574_v7  ;;  %v578_v16 = vld [vmem:[%s1692_s5 + $0x10] sm:$0xff] (!%p272_p2)  ;;  %v579_v17 = vld [vmem:[%s1692_s5 + $0x18] sm:$0xff] (!%p272_p2) }
   0x8   : > { %1394 = vmatprep.subr.bf16.mxu0 (!%p272_p2), %v1393_v4  ;;  %v1389_v19 = vpack.c.bf16 (!%p272_p2), %v579_v17, %v578_v16 }
   0x9   : > { %1386 = vmatprep.subr.bf16.mxu1 (!%p272_p2), %v1385_v6  ;;  %1396 = vmatpush3.bf16.msra.mxu0 (!%p272_p2), %v1393_v4 }
   0xa   : > { %1388 = vmatpush3.bf16.msra.mxu1 (!%p272_p2), %v1385_v6  ;;  %1398 = vmatprep.subr.bf16.mxu0 (!%p272_p2), %v1397_v11 }
   0xb   : > { %1390 = vmatprep.subr.bf16.mxu1 (!%p272_p2), %v1389_v19 }
   0xd   : > { %s1696_s26 = smov (!%p319_p3, %s1119_s26), 31  ;;  %1400 = vmatpush3.bf16.msra.mxu0 %v1397_v11 }
   0xe   : > { %s1126_s12 = sshll.u32 %s1696_s26, 3  ;;  %s1518_s20 = sshll.u32 %s1696_s26, 2  ;;  %1392 = vmatpush3.bf16.msra.mxu1 %v1389_v19 }
   0xf   : > { %s1505_s15 = scalar_lea.vmem %s1690_s3, %s1126_s12  ;;  %s1524_s23 = scalar_lea.vmem %s1688_s1, %s1518_s20 }
  0x10   : > { %v462_v9 = vld [vmem:[%s1505_s15 + $0x10] sm:$0xff]  ;;  %v460_v10 = vld [vmem:[%s1505_s15] sm:$0xff]  ;;  %v463_v12 = vld [vmem:[%s1505_s15 + $0x18] sm:$0xff]  ;;  %s1572_s9 = scalar_lea.vmem %s1687_s0, %s1518_s20  ;;  %s1578_s13 = scalar_lea.vmem %s1689_s2, %s1518_s20 }
  0x11   : > { %488 = vperm.xlu1 %1427, %v462_v9   ;;  %478 = vperm.xlu0 %1426, %v460_v10   ;;  %v461_v13 = vld [vmem:[%s1505_s15 + $0x8] sm:$0xff]  ;;  %v464_v15 = vld [vmem:[%s1505_s15 + $0x20] sm:$0xff]  ;;  %v467_v23 = vld [vmem:[%s1505_s15 + $0x38] sm:$0xff]  ;;  %s1631_s18 = scalar_lea.vmem %s1694_s7, %s1126_s12 }
  0x12   : > { %v465_v14 = vld [vmem:[%s1505_s15 + $0x28] sm:$0xff]  ;;  %v1197_v18 = vld [vmem:[%s1524_s23] sm:$0xff]   ;;  %v466_v24 = vld [vmem:[%s1505_s15 + $0x30] sm:$0xff] }
  0x13   : > { %v1198_v20 = vunpack.c.l.bf16 %v1197_v18  ;;  %v1267_v21 = vld [vmem:[%s1524_s23 + $0x8] sm:$0xff]   ;;  %v1199_v22 = vunpack.c.h.bf16 %v1197_v18  ;;  %v1268_v26 = vld [vmem:[%s1524_s23 + $0x10] sm:$0xff]   ;;  %v468_v30 = vld [vmem:[%s1505_s15 + $0x40] sm:$0xff] }
  0x14   : > { %v1202_v25 = vunpack.c.l.bf16 %v1267_v21  ;;  %v1203_v27 = vunpack.c.h.bf16 %v1267_v21  ;;  %v1206_v28 = vunpack.c.l.bf16 %v1268_v26  ;;  %v469_v29 = vld [vmem:[%s1505_s15 + $0x48] sm:$0xff]  ;;  %v1269_v31 = vld [vmem:[%s1524_s23 + $0x18] sm:$0xff]   ;;  %v1207_v32 = vunpack.c.h.bf16 %v1268_v26  ;;  %v470_v35 = vld [vmem:[%s1505_s15 + $0x50] sm:$0xff] }
  0x15   : > { %493 = vperm.xlu1 %1427, %v463_v12   ;;  %483 = vperm.xlu0 %1426, %v461_v13   ;;  %v1210_v33 = vunpack.c.l.bf16 %v1269_v31  ;;  %v471_v34 = vld [vmem:[%s1505_s15 + $0x58] sm:$0xff]  ;;  %v1270_v36 = vld [vmem:[%s1524_s23 + $0x20] sm:$0xff]   ;;  %v1211_v37 = vunpack.c.h.bf16 %v1269_v31  ;;  %v473_v39 = vld [vmem:[%s1505_s15 + $0x68] sm:$0xff] }
  0x16   : > { %1361 = vmatprep.mubr.msk.f32.mxu0 %vm580_vm0, %v1198_v20  ;;  %v1214_v38 = vunpack.c.l.bf16 %v1270_v36  ;;  %v472_v40 = vld [vmem:[%s1505_s15 + $0x60] sm:$0xff]  ;;  %v1271_v41 = vld [vmem:[%s1524_s23 + $0x28] sm:$0xff]   ;;  %v1215_v42 = vunpack.c.h.bf16 %v1270_v36  ;;  %v475_v44 = vld [vmem:[%s1505_s15 + $0x78] sm:$0xff] }
  0x17   : > { %1362 = vmatmul.mubr.msk.f32.vlgmr.msra.gmra.mrb[0].mxu0 %vm580_vm0, %v1199_v22  ;;  %v1218_v43 = vunpack.c.l.bf16 %v1271_v41  ;;  %v474_v45 = vld [vmem:[%s1505_s15 + $0x70] sm:$0xff]  ;;  %v1219_v47 = vunpack.c.h.bf16 %v1271_v41  ;;  %v1273_v49 = vld [vmem:[%s1524_s23 + $0x38] sm:$0xff]   ;;  %v1165_v53 = vld [vmem:[%s1572_s9] sm:$0xff]  }
  0x18   : > { %1364 = vmatprep.mubr.msk.f32.mxu0 %vm580_vm0, %v1202_v25  ;;  %v1272_v46 = vld [vmem:[%s1524_s23 + $0x30] sm:$0xff]   ;;  %v1226_v51 = vunpack.c.l.bf16 %v1273_v49  ;;  %v1227_v52 = vunpack.c.h.bf16 %v1273_v49  ;;  %v1229_v54 = vld [vmem:[%s1578_s13] sm:$0xff]   ;;  %v1260_v55 = vld [vmem:[%s1572_s9 + $0x8] sm:$0xff]   ;;  %v1166_v57 = vunpack.c.l.bf16 %v1165_v53  ;;  %v1167_v62 = vunpack.c.h.bf16 %v1165_v53 }
  0x19   : > { %503 = vperm.xlu1 %1427, %v465_v14   ;;  %498 = vperm.xlu0 %1426, %v464_v15   ;;  %v1222_v48 = vunpack.c.l.bf16 %v1272_v46  ;;  %v1223_v50 = vunpack.c.h.bf16 %v1272_v46  ;;  %v1274_v56 = vld [vmem:[%s1578_s13 + $0x8] sm:$0xff]   ;;  %v1230_v58 = vunpack.c.l.bf16 %v1229_v54  ;;  %v1170_v59 = vunpack.c.l.bf16 %v1260_v55  ;;  %v1261_v0 = vld [vmem:[%s1572_s9 + $0x10] sm:$0xff]   ;;  %v1262_v11 = vld [vmem:[%s1572_s9 + $0x18] sm:$0xff]  }
  0x1a   : > { %v1234_v60 = vunpack.c.l.bf16 %v1274_v56  ;;  %v1231_v63 = vunpack.c.h.bf16 %v1229_v54  ;;  %v1275_v1 = vld [vmem:[%s1578_s13 + $0x10] sm:$0xff]   ;;  %v1171_v5 = vunpack.c.h.bf16 %v1260_v55  ;;  %v1235_v6 = vunpack.c.h.bf16 %v1274_v56  ;;  %v1276_v12 = vld [vmem:[%s1578_s13 + $0x18] sm:$0xff]   ;;  %v1278_v36 = vld [vmem:[%s1578_s13 + $0x28] sm:$0xff]  }
  0x1b   : > { %1365 = vmatmul.mubr.msk.f32.gmra.mrb[2].mxu0 %vm580_vm0, %v1203_v27  ;;  %v444_v61 = vsub.f32 %v1166_v57, %v1230_v58  ;;  %v1174_v9 = vunpack.c.l.bf16 %v1261_v0  ;;  %v1238_v10 = vunpack.c.l.bf16 %v1275_v1  ;;  %v1175_v17 = vunpack.c.h.bf16 %v1261_v0 }
  0x1c   : > { %1367 = vmatprep.mubr.msk.f32.mxu0 %vm580_vm0, %v1206_v28  ;;  %v446_v3 = vsub.f32 %v1170_v59, %v1234_v60  ;;  %v445_v8 = vsub.f32 %v1167_v62, %v1231_v63  ;;  %v447_v15 = vsub.f32 %v1171_v5, %v1235_v6  ;;  %v1239_v18 = vunpack.c.h.bf16 %v1275_v1  ;;  %v1266_v59 = vld [vmem:[%s1572_s9 + $0x38] sm:$0xff]  }
  0x1d   : > { %513 = vperm.xlu1 %1427, %v467_v23   ;;  %508 = vperm.xlu0 %1426, %v466_v24   ;;  %v448_v20 = vsub.f32 %v1174_v9, %v1238_v10  ;;  %v1178_v21 = vunpack.c.l.bf16 %v1262_v11  ;;  %v1242_v22 = vunpack.c.l.bf16 %v1276_v12  ;;  %v1263_v23 = vld [vmem:[%s1572_s9 + $0x20] sm:$0xff]   ;;  %v1179_v27 = vunpack.c.h.bf16 %v1262_v11  ;;  %v1280_v60 = vld [vmem:[%s1578_s13 + $0x38] sm:$0xff]  }
  0x1e   : > { %v1277_v24 = vld [vmem:[%s1578_s13 + $0x20] sm:$0xff]   ;;  %v1243_v28 = vunpack.c.h.bf16 %v1276_v12  ;;  %v1250_v46 = vunpack.c.l.bf16 %v1278_v36  ;;  %v1194_v5 = vunpack.c.l.bf16 %v1266_v59  ;;  %v1258_v6 = vunpack.c.l.bf16 %v1280_v60 }
  0x1f   : > { %1368 = vmatmul.mubr.msk.f32.gmra.mrb[4].mxu0 %vm580_vm0, %v1207_v32  ;;  %v449_v32 = vsub.f32 %v1175_v17, %v1239_v18  ;;  %v1247_v41 = vunpack.c.h.bf16 %v1277_v24  ;;  %v1195_v10 = vunpack.c.h.bf16 %v1266_v59 }
  0x20   : > { %1370 = vmatprep.mubr.msk.f32.mxu0 %vm580_vm0, %v1210_v33 }
  0x21   : > { %523 = vperm.xlu1 %1427, %v469_v29   ;;  %518 = vperm.xlu0 %1426, %v468_v30   ;;  %v1182_v29 = vunpack.c.l.bf16 %v1263_v23  ;;  %v1246_v30 = vunpack.c.l.bf16 %v1277_v24 }
  0x23   : > { %1371 = vmatmul.mubr.msk.f32.gmra.mrb[6].mxu0 %vm580_vm0, %v1211_v37 }
  0x24   : > { %1373 = vmatprep.mubr.msk.f32.mxu0 %vm580_vm0, %v1214_v38  ;;  %v451_v38 = vsub.f32 %v1179_v27, %v1243_v28 }
  0x25   : > { %533 = vperm.xlu1 %1427, %v471_v34   ;;  %528 = vperm.xlu0 %1426, %v470_v35   ;;  %v450_v34 = vsub.f32 %v1178_v21, %v1242_v22  ;;  %v1264_v35 = vld [vmem:[%s1572_s9 + $0x28] sm:$0xff]  }
  0x27   : > { %1374 = vmatmul.mubr.msk.f32.gmra.mrb[8].mxu0 %vm580_vm0, %v1215_v42  ;;  %v452_v42 = vsub.f32 %v1182_v29, %v1246_v30 }
  0x28   : > { %1376 = vmatprep.mubr.msk.f32.mxu0 %vm580_vm0, %v1218_v43 }
  0x29   : > { %543 = vperm.xlu1 %1427, %v473_v39   ;;  %538 = vperm.xlu0 %1426, %v472_v40   ;;  %v1183_v40 = vunpack.c.h.bf16 %v1263_v23 }
  0x2b   : > { %1377 = vmatmul.mubr.msk.f32.gmra.mrb[10].mxu0 %vm580_vm0, %v1219_v47  ;;  %v1265_v47 = vld [vmem:[%s1572_s9 + $0x30] sm:$0xff]   ;;  %v453_v56 = vsub.f32 %v1183_v40, %v1247_v41 }
  0x2c   : > { %1379 = vmatprep.mubr.msk.f32.mxu0 %vm580_vm0, %v1222_v48  ;;  %v1279_v48 = vld [vmem:[%s1578_s13 + $0x30] sm:$0xff]   ;;  %v1190_v53 = vunpack.c.l.bf16 %v1265_v47  ;;  %v1191_v0 = vunpack.c.h.bf16 %v1265_v47 }
  0x2d   : > { %553 = vperm.xlu1 %1427, %v475_v44   ;;  %548 = vperm.xlu0 %1426, %v474_v45   ;;  %v1186_v45 = vunpack.c.l.bf16 %v1264_v35  ;;  %v1254_v54 = vunpack.c.l.bf16 %v1279_v48  ;;  %v1255_v1 = vunpack.c.h.bf16 %v1279_v48 }
  0x2f   : > { %1380 = vmatmul.mubr.msk.f32.gmra.mrb[12].mxu0 %vm580_vm0, %v1223_v50  ;;  %v454_v58 = vsub.f32 %v1186_v45, %v1250_v46 }
  0x30   : > { %1382 = vmatprep.mubr.msk.f32.mxu0 %vm580_vm0, %v1226_v51  ;;  %v1187_v51 = vunpack.c.h.bf16 %v1264_v35 }
  0x33   : > { %1383 = vmatmul.mubr.msk.f32.gmra.mrb[14].mxu0 %vm580_vm0, %v1227_v52  ;;  %v1251_v52 = vunpack.c.h.bf16 %v1278_v36 }
  0x35   : > { %v455_v62 = vsub.f32 %v1187_v51, %v1251_v52 }
  0x90   : > { %v489_v2 = vpop.permute.xlu1 %488  ;;  %v479_v4 = vpop.permute.xlu0 %478 }
  0x91   : > { %v556_v7 = vmul.f32 %v479_v4, %v444_v61  ;;  %v558_v13 = vmul.f32 %v489_v2, %v446_v3  ;;  %v456_v2 = vsub.f32 %v1190_v53, %v1254_v54 }
  0x93   : > { %1329 = vmatprep.mubr.msk.f32.mxu1 %vm580_vm0, %v556_v7 }
  0x94   : > { %v494_v14 = vpop.permute.xlu1 %493  ;;  %v484_v16 = vpop.permute.xlu0 %483 }
  0x95   : > { %v557_v19 = vmul.f32 %v484_v16, %v445_v8  ;;  %v559_v31 = vmul.f32 %v494_v14, %v447_v15  ;;  %v457_v8 = vsub.f32 %v1191_v0, %v1255_v1  ;;  %v458_v14 = vsub.f32 %v1194_v5, %v1258_v6 }
  0x97   : > { %1330 = vmatmul.mubr.msk.f32.vlgmr.msra.gmra.mrb[0].mxu1 %vm580_vm0, %v557_v19 }
  0x98   : > { %v504_v25 = vpop.permute.xlu1 %503  ;;  %v499_v26 = vpop.permute.xlu0 %498  ;;  %1332 = vmatprep.mubr.msk.f32.mxu1 %vm580_vm0, %v558_v13  ;;  %v1259_v13 = vunpack.c.h.bf16 %v1280_v60 }
  0x99   : > { %v560_v33 = vmul.f32 %v499_v26, %v448_v20  ;;  %v561_v43 = vmul.f32 %v504_v25, %v449_v32 }
  0x9a   : > { %v459_v17 = vsub.f32 %v1195_v10, %v1259_v13 }
  0x9b   : > { %1333 = vmatmul.mubr.msk.f32.gmra.mrb[2].mxu1 %vm580_vm0, %v559_v31 }
  0x9c   : > { %v514_v37 = vpop.permute.xlu1 %513  ;;  %v509_v39 = vpop.permute.xlu0 %508  ;;  %1335 = vmatprep.mubr.msk.f32.mxu1 %vm580_vm0, %v560_v33 }
  0x9d   : > { %v562_v44 = vmul.f32 %v509_v39, %v450_v34  ;;  %v563_v55 = vmul.f32 %v514_v37, %v451_v38  ;;  %v1623_v38 = vld [vmem:[%s1693_s6] ss:$0 sm:$0xff] }
  0x9f   : > { %1336 = vmatmul.mubr.msk.f32.gmra.mrb[4].mxu1 %vm580_vm0, %v561_v43 }
  0xa0   : > { %v524_v49 = vpop.permute.xlu1 %523  ;;  %v519_v50 = vpop.permute.xlu0 %518  ;;  %1338 = vmatprep.mubr.msk.f32.mxu1 %vm580_vm0, %v562_v44 }
  0xa1   : > { %v564_v57 = vmul.f32 %v519_v50, %v452_v42  ;;  %v565_v3 = vmul.f32 %v524_v49, %v453_v56 }
  0xa3   : > { %1339 = vmatmul.mubr.msk.f32.gmra.mrb[6].mxu1 %vm580_vm0, %v563_v55 }
  0xa4   : > { %v534_v61 = vpop.permute.xlu1 %533  ;;  %v529_v63 = vpop.permute.xlu0 %528  ;;  %1341 = vmatprep.mubr.msk.f32.mxu1 %vm580_vm0, %v564_v57 }
  0xa5   : > { %v566_v4 = vmul.f32 %v529_v63, %v454_v58  ;;  %v567_v11 = vmul.f32 %v534_v61, %v455_v62 }
  0xa7   : > { %1342 = vmatmul.mubr.msk.f32.gmra.mrb[8].mxu1 %vm580_vm0, %v565_v3 }
  0xa8   : > { %v544_v7 = vpop.permute.xlu1 %543  ;;  %v539_v9 = vpop.permute.xlu0 %538  ;;  %1344 = vmatprep.mubr.msk.f32.mxu1 %vm580_vm0, %v566_v4 }
  0xa9   : > { %v568_v12 = vmul.f32 %v539_v9, %v456_v2  ;;  %v569_v16 = vmul.f32 %v544_v7, %v457_v8 }
  0xab   : > { %1345 = vmatmul.mubr.msk.f32.gmra.mrb[10].mxu1 %vm580_vm0, %v567_v11 }
  0xac   : > { %v549_v15 = vpop.permute.xlu0 %548  ;;  %1347 = vmatprep.mubr.msk.f32.mxu1 %vm580_vm0, %v568_v12  ;;  %v554_v19 = vpop.permute.xlu1 %553 }
  0xad   : > { %v570_v18 = vmul.f32 %v549_v15, %v458_v14  ;;  %v571_v20 = vmul.f32 %v554_v19, %v459_v17 }
  0xaf   : > { %1348 = vmatmul.mubr.msk.f32.gmra.mrb[12].mxu1 %vm580_vm0, %v569_v16 }
  0xb0   : > { %1350 = vmatprep.mubr.msk.f32.mxu1 %vm580_vm0, %v570_v18 }
  0xb3   : > { %1351 = vmatmul.mubr.msk.f32.gmra.mrb[14].mxu1 %vm580_vm0, %v571_v20 }
  0xea   : > { %v1363_v21 = vpop.f32.mrb[0].mxu0 }
  0xeb   : > { %v888_v22 = vpop.f32.mrb[1].mxu0 }
  0xee   : > { %v1366_v23 = vpop.f32.mrb[2].mxu0 }
  0xef   : > { %v898_v24 = vpop.f32.mrb[3].mxu0 }
  0xf2   : > { %v1369_v25 = vpop.f32.mrb[4].mxu0 }
  0xf3   : > { %v908_v26 = vpop.f32.mrb[5].mxu0 }
  0xf6   : > { %v1372_v27 = vpop.f32.mrb[6].mxu0 }
  0xf7   : > { %v918_v28 = vpop.f32.mrb[7].mxu0 }
  0xfa   : > { %v1375_v29 = vpop.f32.mrb[8].mxu0 }
  0xfb   : > { %v928_v30 = vpop.f32.mrb[9].mxu0 }
  0xfe   : > { %v1378_v31 = vpop.f32.mrb[10].mxu0 }
  0xff   : > { %v938_v32 = vpop.f32.mrb[11].mxu0 }
 0x102   : > { %v1612_v33 = vpop.f32.mrb[12].mxu0 }
 0x103   : > { %v1614_v34 = vpop.f32.mrb[13].mxu0 }
 0x106   : > { %v1616_v35 = vpop.f32.mrb[14].mxu0 }
 0x107   : > { %v1618_v36 = vpop.f32.mrb[15].mxu0 }
 0x16a   : > { %v1331_v37 = vpop.f32.mrb[0].mxu1 }
 0x16b   : > { %v894_v39 = vadd.f32 %v1363_v21, %v1331_v37  ;;  %v695_v40 = vpop.f32.mrb[1].mxu1 }
 0x16c   : > { %v889_v41 = vadd.f32 %v888_v22, %v695_v40 }
 0x16d   : > { %v975_v42 = vadd.f32 %v1623_v38, %v894_v39 }
 0x16e   : > { %v974_v43 = vadd.f32 %v1623_v38, %v889_v41  ;;  %v1334_v44 = vpop.f32.mrb[2].mxu1 }
 0x16f   : > { %v991_v45 = vmax.f32 %v975_v42, 0.0  ;;  %v904_v46 = vadd.f32 %v1366_v23, %v1334_v44  ;;  %v705_v47 = vpop.f32.mrb[3].mxu1 }
 0x170   : > { %v990_v48 = vmax.f32 %v974_v43, 0.0  ;;  %v899_v49 = vadd.f32 %v898_v24, %v705_v47 }
 0x171   : > { %1007 = vst.msk [vmem:[%s1631_s18 + $0x8] sm:$0xff] %vm580_vm0, %v991_v45  ;;  %v977_v50 = vadd.f32 %v1623_v38, %v904_v46 }
 0x172   : > { %1006 = vst.msk [vmem:[%s1631_s18] sm:$0xff] %vm580_vm0, %v990_v48  ;;  %v976_v51 = vadd.f32 %v1623_v38, %v899_v49  ;;  %v1337_v52 = vpop.f32.mrb[4].mxu1 }
 0x173   : > { %v993_v53 = vmax.f32 %v977_v50, 0.0  ;;  %v914_v54 = vadd.f32 %v1369_v25, %v1337_v52  ;;  %v715_v55 = vpop.f32.mrb[5].mxu1 }
 0x174   : > { %v992_v56 = vmax.f32 %v976_v51, 0.0  ;;  %v909_v57 = vadd.f32 %v908_v26, %v715_v55 }
 0x175   : > { %1009 = vst.msk [vmem:[%s1631_s18 + $0x18] sm:$0xff] %vm580_vm0, %v993_v53  ;;  %v979_v58 = vadd.f32 %v1623_v38, %v914_v54 }
 0x176   : > { %1008 = vst.msk [vmem:[%s1631_s18 + $0x10] sm:$0xff] %vm580_vm0, %v992_v56  ;;  %v978_v59 = vadd.f32 %v1623_v38, %v909_v57  ;;  %v1340_v60 = vpop.f32.mrb[6].mxu1 }
 0x177   : > { %v995_v61 = vmax.f32 %v979_v58, 0.0  ;;  %v924_v62 = vadd.f32 %v1372_v27, %v1340_v60  ;;  %v725_v63 = vpop.f32.mrb[7].mxu1 }
 0x178   : > { %v994_v0 = vmax.f32 %v978_v59, 0.0  ;;  %v919_v1 = vadd.f32 %v918_v28, %v725_v63 }
 0x179   : > { %1011 = vst.msk [vmem:[%s1631_s18 + $0x28] sm:$0xff] %vm580_vm0, %v995_v61  ;;  %v981_v2 = vadd.f32 %v1623_v38, %v924_v62 }
 0x17a   : > { %1010 = vst.msk [vmem:[%s1631_s18 + $0x20] sm:$0xff] %vm580_vm0, %v994_v0  ;;  %v980_v3 = vadd.f32 %v1623_v38, %v919_v1  ;;  %v1343_v4 = vpop.f32.mrb[8].mxu1 }
 0x17b   : > { %v997_v5 = vmax.f32 %v981_v2, 0.0  ;;  %v934_v6 = vadd.f32 %v1375_v29, %v1343_v4  ;;  %v735_v7 = vpop.f32.mrb[9].mxu1 }
 0x17c   : > { %v996_v8 = vmax.f32 %v980_v3, 0.0  ;;  %v929_v9 = vadd.f32 %v928_v30, %v735_v7 }
 0x17d   : > { %1013 = vst.msk [vmem:[%s1631_s18 + $0x38] sm:$0xff] %vm580_vm0, %v997_v5  ;;  %v983_v10 = vadd.f32 %v1623_v38, %v934_v6 }
 0x17e   : > { %1012 = vst.msk [vmem:[%s1631_s18 + $0x30] sm:$0xff] %vm580_vm0, %v996_v8  ;;  %v982_v11 = vadd.f32 %v1623_v38, %v929_v9  ;;  %v1346_v12 = vpop.f32.mrb[10].mxu1 }
 0x17f   : > { %v999_v13 = vmax.f32 %v983_v10, 0.0  ;;  %v944_v14 = vadd.f32 %v1378_v31, %v1346_v12  ;;  %v745_v15 = vpop.f32.mrb[11].mxu1 }
 0x180   : > { %v998_v16 = vmax.f32 %v982_v11, 0.0  ;;  %v939_v17 = vadd.f32 %v938_v32, %v745_v15 }
 0x181   : > { %1015 = vst.msk [vmem:[%s1631_s18 + $0x48] sm:$0xff] %vm580_vm0, %v999_v13  ;;  %v985_v18 = vadd.f32 %v1623_v38, %v944_v14 }
 0x182   : > { %1014 = vst.msk [vmem:[%s1631_s18 + $0x40] sm:$0xff] %vm580_vm0, %v998_v16  ;;  %v984_v19 = vadd.f32 %v1623_v38, %v939_v17  ;;  %v1349_v20 = vpop.f32.mrb[12].mxu1 }
 0x183   : > { %v1001_v21 = vmax.f32 %v985_v18, 0.0  ;;  %v954_v22 = vadd.f32 %v1612_v33, %v1349_v20  ;;  %v755_v23 = vpop.f32.mrb[13].mxu1 }
 0x184   : > { %v1000_v24 = vmax.f32 %v984_v19, 0.0  ;;  %v949_v25 = vadd.f32 %v1614_v34, %v755_v23 }
 0x185   : > { %1017 = vst.msk [vmem:[%s1631_s18 + $0x58] sm:$0xff] %vm580_vm0, %v1001_v21  ;;  %v987_v26 = vadd.f32 %v1623_v38, %v954_v22 }
 0x186   : > { %1016 = vst.msk [vmem:[%s1631_s18 + $0x50] sm:$0xff] %vm580_vm0, %v1000_v24  ;;  %v986_v27 = vadd.f32 %v1623_v38, %v949_v25  ;;  %v1352_v28 = vpop.f32.mrb[14].mxu1 }
 0x187   : > { %v1003_v29 = vmax.f32 %v987_v26, 0.0  ;;  %v964_v30 = vadd.f32 %v1616_v35, %v1352_v28  ;;  %v765_v31 = vpop.f32.mrb[15].mxu1 }
 0x188   : > { %v1002_v32 = vmax.f32 %v986_v27, 0.0  ;;  %v959_v33 = vadd.f32 %v1618_v36, %v765_v31 }
 0x189   : > { %1019 = vst.msk [vmem:[%s1631_s18 + $0x68] sm:$0xff] %vm580_vm0, %v1003_v29  ;;  %v989_v34 = vadd.f32 %v1623_v38, %v964_v30 }
 0x18a   : > { %1018 = vst.msk [vmem:[%s1631_s18 + $0x60] sm:$0xff] %vm580_vm0, %v1002_v32  ;;  %v988_v37 = vadd.f32 %v1623_v38, %v959_v33 }
 0x18b   : > { %v1005_v39 = vmax.f32 %v989_v34, 0.0 }
 0x18c   : > { %v1004_v40 = vmax.f32 %v988_v37, 0.0 }
 0x18d   : > { %1021 = vst.msk [vmem:[%s1631_s18 + $0x78] sm:$0xff] %vm580_vm0, %v1005_v39 }
 0x18e   : > { %1020 = vst.msk [vmem:[%s1631_s18 + $0x70] sm:$0xff] %vm580_vm0, %v1004_v40 }
 0x18f PF: > { %s17_s24 = sadd.s32 1, %s1434_s24  }
 0x190   : > { %p14_p4 = scmp.ge.s32.totalorder %s17_s24, 4  }
 0x192   :  { %16 = sbr.rel (!%p14_p4) target bundleno = 1 (0x1), region = 87 }

</bundles_post_ra>
